<compile_context>
chip_gen: v7x
topology: tpu7x:2x2x1
jax: 0.10.0
libtpu: 0.0.40
codegen_flags: <defaults>
</compile_context>

<pallas_src>
import math
import jax
import jax.numpy as jnp
from jax.experimental import pallas as pl
from jax.experimental.pallas import tpu as pltpu

LANE = 128


def _linear_kernel(x_ref, w_ref, b_ref, o_ref, acc_ref):
    # x_ref: (tm, tk) f32   w_ref: (tk, tn) bf16   b_ref: (1, tn) f32
    # o_ref: (tm, tn) out   acc_ref: (tm, tn) f32 scratch (lives across K steps)
    k = pl.program_id(2)

    @pl.when(k == 0)
    def _():
        # Fold the bias into the accumulator init: no zero-fill, no final add.
        acc_ref[...] = jnp.broadcast_to(b_ref[...], acc_ref.shape)

    # Cast the activation tile in-kernel (VPU cast overlaps with the MXU);
    # accumulate in f32 on the MXU result path.
    acc_ref[...] += jnp.dot(
        x_ref[...].astype(jnp.bfloat16),
        w_ref[...],
        preferred_element_type=jnp.float32,
    )

    @pl.when(k == pl.num_programs(2) - 1)
    def _():
        o_ref[...] = acc_ref[...].astype(o_ref.dtype)


def _round_up(x, m):
    return (x + m - 1) // m * m


def _pick_tile(dim, pref, unit=LANE):
    """Largest multiple of `unit` that divides `dim` (a multiple of `unit`),
    not exceeding max(pref, unit)."""
    t = max((min(pref, dim) // unit) * unit, unit)
    while dim % t != 0:
        t -= unit
    return t


def prepare_linear_params(w_t, bias):
    """One-time packing of nn.Linear params for the kernel hot path.

    w_t:  (n_in, n_out) f32, weight already transposed.
    bias: (n_out,)      f32.

    Returns (w_packed, b_packed, n_out):
      w_packed: (K, N) bf16, K/N rounded up to multiples of 128, zero-padded.
                K zero-padding is required for correct accumulation; N padding
                keeps stores lane-dense and is sliced off after the call.
      b_packed: (1, N) f32, zero-padded.
    """
    n_in, n_out = w_t.shape
    K = _round_up(n_in, LANE)
    N = _round_up(n_out, LANE)
    w_packed = jnp.pad(w_t.astype(jnp.bfloat16), ((0, K - n_in), (0, N - n_out)))
    b_packed = jnp.pad(bias.astype(jnp.float32), (0, N - n_out)).reshape(1, N)
    return w_packed, b_packed, n_out


def linear_forward(x, w_packed, b_packed, n_out, *, tm=256, tn=1024, tk=1024):
    """Compute x.reshape(B, -1) @ W^T + b with a tiled Pallas TPU kernel.

    x:        any shape with leading batch dim B (flattened row-major, like x.view(B, -1))
    w_packed: (K, N) bf16 from prepare_linear_params
    b_packed: (1, N) f32  from prepare_linear_params
    n_out:    logical output width (result is sliced to (B, n_out))
    """
    B = x.shape[0]
    x2d = x.reshape(B, -1)
    n_in = x2d.shape[1]
    K, N = w_packed.shape
    assert K >= n_in and K % LANE == 0 and N % LANE == 0, (x2d.shape, w_packed.shape)
    out_dtype = x2d.dtype
    out_itemsize = jnp.dtype(out_dtype).itemsize

    # ---- tile selection ----------------------------------------------------
    tk = _pick_tile(K, tk)
    tn = _pick_tile(N, tn)
    if B <= tm:
        tm = B            # block equals full array dim -> legal, no M padding
        M = B
    else:
        tm = tm - (tm % 8) if tm % 8 else tm
        M = _round_up(B, tm)

    grid_m, grid_n = M // tm, N // tn
    # v7x has 2 TensorCores: keep >= 2 blocks on a parallel axis when possible.
    if grid_m == 1 and grid_n == 1 and N >= 2 * LANE:
        tn = _pick_tile(N, N // 2)
        grid_n = N // tn
    grid_k = K // tk
    grid = (grid_m, grid_n, grid_k)

    # ---- wrapper-side padding of x only when strictly necessary ------------
    # K must be zero-padded (garbage would corrupt the accumulation); M padding
    # only when B > tm and not divisible.  Single pad op (or none at all).
    if (M, K) != (B, n_in):
        x2d = jnp.pad(x2d, ((0, M - B), (0, K - n_in)))

    # ---- VMEM budget / cost hint -------------------------------------------
    x_itemsize = jnp.dtype(x2d.dtype).itemsize
    vmem_need = (
        2 * tm * tk * x_itemsize        # x tiles (double-buffered)
        + 2 * tk * tn * 2               # w tiles (bf16)
        + 2 * 1 * tn * 4                # bias tiles
        + 2 * tm * tn * out_itemsize    # output tiles
        + tm * tn * 4                   # f32 accumulator scratch
    )
    vmem_limit = int(min(max(2 * vmem_need, 32 * 1024 * 1024), 48 * 1024 * 1024))

    cost = pl.CostEstimate(
        flops=2 * M * N * K,
        transcendentals=0,
        bytes_accessed=(
            x2d.size * x_itemsize * grid_n      # x re-read once per N tile
            + w_packed.size * 2 * grid_m        # w re-read once per M tile
            + b_packed.size * 4 * grid_m * grid_n
            + M * N * out_itemsize
        ),
    )

    out = pl.pallas_call(
        _linear_kernel,
        out_shape=jax.ShapeDtypeStruct((M, N), out_dtype),
        grid_spec=pltpu.PrefetchScalarGridSpec(
            num_scalar_prefetch=0,
            grid=grid,
            in_specs=[
                pl.BlockSpec((tm, tk), lambda i, j, k: (i, k)),   # x tile (f32)
                pl.BlockSpec((tk, tn), lambda i, j, k: (k, j)),   # w tile (bf16)
                pl.BlockSpec((1, tn), lambda i, j, k: (0, j)),    # bias tile
            ],
            out_specs=pl.BlockSpec((tm, tn), lambda i, j, k: (i, j)),
            scratch_shapes=[pltpu.VMEM((tm, tn), jnp.float32)],
        ),
        compiler_params=pltpu.CompilerParams(
            dimension_semantics=("parallel", "parallel", "arbitrary"),
            vmem_limit_bytes=vmem_limit,
        ),
        cost_estimate=cost,
    )(x2d, w_packed, b_packed)

    # Slice lane padding (and any M padding) back off.
    return out[:B, :n_out]


def init_linear_params(key, n_in, n_out, dtype=jnp.float32):
    """torch.nn.Linear-style init (U(-1/sqrt(n_in), 1/sqrt(n_in))).

    Returns the *logical* f32 params; pack them once with prepare_linear_params
    before the hot path.  Weight is returned pre-transposed as (n_in, n_out).
    """
    kw, kb = jax.random.split(key)
    bound = 1.0 / math.sqrt(n_in)
    w_t = jax.random.uniform(kw, (n_in, n_out), dtype, minval=-bound, maxval=bound)
    bias = jax.random.uniform(kb, (n_out,), dtype, minval=-bound, maxval=bound)
    return w_t, bias


if __name__ == "__main__":
    key = jax.random.PRNGKey(0)
    k_x, k_p = jax.random.split(key)

    # Small NCHW-style input: (batch=2, channels=4, 16, 16) -> n_in = 4*16*16 = 1024
    B, C, H, W = 2, 4, 16, 16
    n_in = C * H * W
    n_out = 32

    x = jax.random.normal(k_x, (B, C, H, W), jnp.float32)
    w_t, bias = init_linear_params(k_p, n_in, n_out)

    # One-time param packing (bf16 cast + lane padding) outside the hot path.
    w_packed, b_packed, n_out_logical = prepare_linear_params(w_t, bias)

    y = linear_forward(x, w_packed, b_packed, n_out_logical)
    y = jax.block_until_ready(y)

    # Reference: same math as PyTorch nn.Linear (f32).  Kernel uses bf16 matmul
    # operands with f32 accumulation, so compare with a bf16-appropriate tolerance.
    # TODO(synk): offer an f32-operand path for users needing f32-exact results.
    y_ref = x.reshape(B, -1) @ w_t + bias
    assert y.shape == (B, n_out)
    assert jnp.allclose(y, y_ref, atol=2e-2, rtol=2e-2), (
        float(jnp.max(jnp.abs(y - y_ref)))
    )

    print("KERNEL_OK")
</pallas_src>

<mosaic_0001>
module attributes {stable_mosaic.version = 11 : i64} {
  func.func @_linear_kernel(%arg0: i32, %arg1: i32, %arg2: i32, %arg3: memref<2x1024xf32, #tpu.memory_space<vmem>>, %arg4: memref<1024x128xbf16, #tpu.memory_space<vmem>>, %arg5: memref<1x128xf32, #tpu.memory_space<vmem>>, %arg6: memref<2x128xf32, #tpu.memory_space<vmem>>, %arg7: memref<2x128xf32, #tpu.memory_space<vmem>>) attributes {dimension_semantics = [#tpu.dimension_semantics<parallel>, #tpu.dimension_semantics<parallel>, #tpu.dimension_semantics<arbitrary>], iteration_bounds = array<i64: 1, 1, 1>, scalar_prefetch = 0 : i64, scratch_operands = 1 : i64, tpu.core_type = #tpu.core_type<tc>, window_params = [{transform_indices = @transform_0, window_bounds = array<i64: 2, 1024>}, {transform_indices = @transform_1, window_bounds = array<i64: 1024, 128>}, {transform_indices = @transform_2, window_bounds = array<i64: 1, 128>}, {transform_indices = @transform_3, window_bounds = array<i64: 2, 128>}]} {
    %c0_i32 = arith.constant 0 : i32
    %0 = arith.cmpi eq, %arg2, %c0_i32 : i32
    %1 = arith.extui %0 : i1 to i32
    %c0_i32_0 = arith.constant 0 : i32
    %2 = arith.cmpi ne, %1, %c0_i32_0 : i32
    scf.if %2 {
      %c0_10 = arith.constant 0 : index
      %c0_11 = arith.constant 0 : index
      %13 = vector.load %arg5[%c0_10, %c0_11] : memref<1x128xf32, #tpu.memory_space<vmem>>, vector<1x128xf32>
      %14 = vector.shape_cast %13 : vector<1x128xf32> to vector<1x128xf32>
      %15 = vector.broadcast %14 : vector<1x128xf32> to vector<2x128xf32>
      %c0_12 = arith.constant 0 : index
      %c0_13 = arith.constant 0 : index
      %16 = vector.load %arg7[%c0_12, %c0_13] : memref<2x128xf32, #tpu.memory_space<vmem>>, vector<2x128xf32>
      tpu.vector_store %arg7[%c0_12, %c0_13], %15 {strides = array<i32>} : memref<2x128xf32, #tpu.memory_space<vmem>>, vector<2x128xf32>,
    } else {
    }
    %c0 = arith.constant 0 : index
    %c0_1 = arith.constant 0 : index
    %3 = vector.load %arg7[%c0, %c0_1] : memref<2x128xf32, #tpu.memory_space<vmem>>, vector<2x128xf32>
    %c0_2 = arith.constant 0 : index
    %c0_3 = arith.constant 0 : index
    %4 = vector.load %arg3[%c0_2, %c0_3] : memref<2x1024xf32, #tpu.memory_space<vmem>>, vector<2x1024xf32>
    %5 = arith.truncf %4 : vector<2x1024xf32> to vector<2x1024xbf16>
    %c0_4 = arith.constant 0 : index
    %c0_5 = arith.constant 0 : index
    %6 = vector.load %arg4[%c0_4, %c0_5] : memref<1024x128xbf16, #tpu.memory_space<vmem>>, vector<1024x128xbf16>
    %cst = arith.constant dense<0.000000e+00> : vector<2x128xf32>
    %7 = tpu.matmul %5, %6, %cst {dimension_numbers = #tpu.dot_dimension_numbers<[1], [0], [0], [1], [0, 0, 1, 1], [], []>} : vector<2x1024xbf16>, vector<1024x128xbf16>, vector<2x128xf32> -> vector<2x128xf32>
    %8 = arith.addf %3, %7 : vector<2x128xf32>
    %c0_6 = arith.constant 0 : index
    %c0_7 = arith.constant 0 : index
    %9 = vector.load %arg7[%c0_6, %c0_7] : memref<2x128xf32, #tpu.memory_space<vmem>>, vector<2x128xf32>
    tpu.vector_store %arg7[%c0_6, %c0_7], %8 {strides = array<i32>} : memref<2x128xf32, #tpu.memory_space<vmem>>, vector<2x128xf32>,
    %c0_i32_8 = arith.constant 0 : i32
    %10 = arith.cmpi eq, %arg2, %c0_i32_8 : i32
    %11 = arith.extui %10 : i1 to i32
    %c0_i32_9 = arith.constant 0 : i32
    %12 = arith.cmpi ne, %11, %c0_i32_9 : i32
    scf.if %12 {
      %c0_10 = arith.constant 0 : index
      %c0_11 = arith.constant 0 : index
      %13 = vector.load %arg7[%c0_10, %c0_11] : memref<2x128xf32, #tpu.memory_space<vmem>>, vector<2x128xf32>
      %c0_12 = arith.constant 0 : index
      %c0_13 = arith.constant 0 : index
      %14 = vector.load %arg6[%c0_12, %c0_13] : memref<2x128xf32, #tpu.memory_space<vmem>>, vector<2x128xf32>
      tpu.vector_store %arg6[%c0_12, %c0_13], %13 {strides = array<i32>} : memref<2x128xf32, #tpu.memory_space<vmem>>, vector<2x128xf32>,
    } else {
    }
    return
  }
  func.func @transform_0(%arg0: i32, %arg1: i32, %arg2: i32) -> (i32, i32) {
    %c0_i32 = arith.constant 0 : i32
    return %arg0, %arg2 : i32, i32
  }
  func.func @transform_1(%arg0: i32, %arg1: i32, %arg2: i32) -> (i32, i32) {
    %c0_i32 = arith.constant 0 : i32
    return %arg2, %arg1 : i32, i32
  }
  func.func @transform_2(%arg0: i32, %arg1: i32, %arg2: i32) -> (i32, i32) {
    %c0_i32 = arith.constant 0 : i32
    %c0_i32_0 = arith.constant 0 : i32
    return %c0_i32, %arg1 : i32, i32
  }
  func.func @transform_3(%arg0: i32, %arg1: i32, %arg2: i32) -> (i32, i32) {
    %c0_i32 = arith.constant 0 : i32
    return %arg0, %arg1 : i32, i32
  }
}

</mosaic_0001>

<bundles_post_ra>
// kernel: tpu_custom_call.1
= control target key start
LH: loop header
LB: loop body
LE: loop exit
PB: predicated region body
PF: predicated region fallthrough
CT: control target
= control target key end

     0   :  { %8 = vsyncpa [#allocation4], 0  ;;  %s1179_s0 = inlined_call_operand.hbm [shape: f32[2,1024], index: 0, kind: input, shape index: {}]   ;;  %s1180_s1 = inlined_call_operand.hbm [shape: bf16[1024,128], index: 1, kind: input, shape index: {}]   ;;  %s1181_s2 = inlined_call_operand.vmem [shape: f32[1,128], index: 2, kind: input, shape index: {}]   ;;  %s1182_s3 = inlined_call_operand.hbm [shape: f32[2,128], index: 3, kind: output, shape index: {}]  }
   0x1   :  { %9 = vsyncpa [#allocation7], 0 }
   0x2   :  { %10 = vsyncpa [#allocation5], 0  ;;  %s1101_s12 = smov [#allocation3]   ;;  %s1102_s14 = smov [#allocation6]  }
   0x3   :  { %s17_s13 = sshll.u32 %s1101_s12, 4  ;;  %s26_s15 = sshll.u32 %s1102_s14, 4  ;;  %s18_s13 = int_to_ptr.vmem [resolvable:$true] %s17_s13  ;;  %s1127_s15 = int_to_ptr.vmem [resolvable:$true] %s26_s15 }
   0x4   :  { %s1029_s18 = scalar_lea.hbm %s1179_s0, 256 }
   0x5   :  { %p1030_p0 = scmp.ne.s32.totalorder %s1179_s0, %s1029_s18  ;;  %p1033_p1 = scmp.lt.u32.totalorder %s1029_s18, %s1179_s0 }
   0x7   :  { %p1035_p2 = pnand %p1033_p1, %p1030_p0 }
   0x9   :  { %1038 = shalt.err (!%p1035_p2)
}
   0xa   :  { %s1039_s23 = scalar_lea.vmem %s18_s13, 256  ;;  %p1044_p4 = scmp.lt.s32.totalorder %s18_s13, %s18_s13 }
   0xb   :  { %p1040_p3 = scmp.ne.s32.totalorder %s18_s13, %s1039_s23  ;;  %p1045_p5 = scmp.lt.s32.totalorder %s1039_s23, %s1039_s23 }
   0xd   :  { %p1046_p6 = por %p1045_p5, %p1044_p4 }
   0xf   :  { %p1047_p7 = pnand %p1046_p6, %p1040_p3 }
  0x11   :  { %1050 = shalt.err (!%p1047_p7)
}
  0x12   :  { %20 = dma.hbm_to_vmem [thread:$0]  %s1179_s0, 256, %s18_s13, [#allocation4]  }
  0x13   :  { %s1051_s28 = scalar_lea.hbm %s1180_s1, 8192 }
  0x14   :  { %p1052_p8 = scmp.ne.s32.totalorder %s1180_s1, %s1051_s28  ;;  %p1055_p9 = scmp.lt.u32.totalorder %s1051_s28, %s1180_s1 }
  0x16   :  { %p1057_p10 = pnand %p1055_p9, %p1052_p8 }
  0x18   :  { %1060 = shalt.err (!%p1057_p10)
}
  0x19   :  { %s1061_s6 = scalar_lea.vmem %s1127_s15, 8192  ;;  %p1066_p12 = scmp.lt.s32.totalorder %s1127_s15, %s1127_s15 }
  0x1a   :  { %p1062_p11 = scmp.ne.s32.totalorder %s1127_s15, %s1061_s6  ;;  %p1067_p13 = scmp.lt.s32.totalorder %s1061_s6, %s1061_s6 }
  0x1c   :  { %p1068_p0 = por %p1067_p13, %p1066_p12 }
  0x1e   :  { %p1069_p1 = pnand %p1068_p0, %p1062_p11 }
  0x20   :  { %1072 = shalt.err (!%p1069_p1)
}
  0x21   :  { %s1103_s0 = smov 64   ;;  %s1104_s7 = smov 4  }
  0x22   :  { %32 = dma.hbm_to_vmem [thread:$0]  %s1180_s1, 8192, %s1127_s15, [#allocation7], %s1103_s0, %s1103_s0, %s1104_s7  }
  0x23   :  { %1095 = dma.done.wait [#allocation4], 256  }
  0x24   :  { %1096 = vsyncadd [#allocation4], 4294967040 }
  0x25   :  { %1097 = dma.done.wait [#allocation7], 8192  }
  0x26   :  { %1098 = vsyncadd [#allocation7], 4294959104  ;;  %v963_v0 = vld [vmem:[#allocation6 + $0x40] sm:$0xff]   ;;  %v967_v4 = vld [vmem:[#allocation6 + $0x48] sm:$0xff]   ;;  %v1105_v22 = vmov 1983009808   ;;  %v63_v24 = vlaneseq }
  0x27   :  { %v964_v1 = vld [vmem:[#allocation6 + $0xc0] sm:$0xff]   ;;  %869 = vmatprep.subr.bf16.mxu0 %v963_v0  ;;  %v968_v5 = vld [vmem:[#allocation6 + $0xc8] sm:$0xff]   ;;  %v971_v8 = vld [vmem:[#allocation6 + $0x50] sm:$0xff]   ;;  %v61_v23 = vunpack.c.l.s4 %v1105_v22 }
  0x28   :  { %v965_v2 = vld [vmem:[#allocation6] sm:$0xff]   ;;  %891 = vmatprep.subr.bf16.mxu1 %v964_v1  ;;  %v969_v6 = vld [vmem:[#allocation6 + $0x8] sm:$0xff]   ;;  %v972_v9 = vld [vmem:[#allocation6 + $0xd0] sm:$0xff]   ;;  %v64_v30 = vshrl.u32 %v63_v24, 7 }
  0x29   :  { %v966_v3 = vld [vmem:[#allocation6 + $0x80] sm:$0xff]   ;;  %870 = vmatpush3.bf16.msra.mxu0 %v965_v2  ;;  %v970_v7 = vld [vmem:[#allocation6 + $0x88] sm:$0xff]   ;;  %v973_v10 = vld [vmem:[#allocation6 + $0x10] sm:$0xff]   ;;  %v62_v29 = vunpack.c.0.s8 %v61_v23 }
  0x2a   :  { %892 = vmatpush3.bf16.msra.mxu1 %v966_v3  ;;  %871 = vmatprep.subr.bf16.mxu0 %v967_v4  ;;  %v974_v11 = vld [vmem:[#allocation6 + $0x90] sm:$0xff]   ;;  %v975_v12 = vld [vmem:[#allocation6 + $0x58] sm:$0xff]   ;;  %v979_v16 = vld [vmem:[#allocation6 + $0x60] sm:$0xff]  }
  0x2b   :  { %893 = vmatprep.subr.bf16.mxu1 %v968_v5  ;;  %v976_v13 = vld [vmem:[#allocation6 + $0xd8] sm:$0xff]   ;;  %v980_v17 = vld [vmem:[#allocation6 + $0xe0] sm:$0xff]   ;;  %v983_v20 = vld [vmem:[#allocation6 + $0x68] sm:$0xff]   ;;  %v1158_v35 = vsub.s32 %v62_v29, %v64_v30 }
  0x2c   :  { %v977_v14 = vld [vmem:[#allocation6 + $0x18] sm:$0xff]   ;;  %v981_v18 = vld [vmem:[#allocation6 + $0x20] sm:$0xff]   ;;  %v984_v21 = vld [vmem:[#allocation6 + $0xe8] sm:$0xff]  }
  0x2d   :  { %872 = vmatpush3.bf16.msra.mxu0 %v969_v6  ;;  %v978_v15 = vld [vmem:[#allocation6 + $0x98] sm:$0xff]   ;;  %v982_v19 = vld [vmem:[#allocation6 + $0xa0] sm:$0xff]   ;;  %v985_v25 = vld [vmem:[#allocation6 + $0x28] sm:$0xff]  }
  0x2e   :  { %894 = vmatpush3.bf16.msra.mxu1 %v970_v7  ;;  %873 = vmatprep.subr.bf16.mxu0 %v971_v8  ;;  %v986_v26 = vld [vmem:[#allocation6 + $0xa8] sm:$0xff]   ;;  %v987_v27 = vld [vmem:[#allocation6 + $0x70] sm:$0xff]   ;;  %v991_v33 = vld [vmem:[#allocation6 + $0x78] sm:$0xff]  }
  0x2f   :  { %895 = vmatprep.subr.bf16.mxu1 %v972_v9  ;;  %v988_v28 = vld [vmem:[#allocation6 + $0xf0] sm:$0xff]   ;;  %v992_v34 = vld [vmem:[#allocation6 + $0xf8] sm:$0xff]   ;;  %v996_v41 = vld [vmem:[#allocation6 + $0x140] sm:$0xff]  }
  0x30   :  { %v989_v31 = vld [vmem:[#allocation6 + $0x30] sm:$0xff]   ;;  %v993_v36 = vld [vmem:[#allocation6 + $0x38] sm:$0xff]   ;;  %v997_v42 = vld [vmem:[#allocation6 + $0x1c0] sm:$0xff]  }
  0x31   :  { %874 = vmatpush3.bf16.msra.mxu0 %v973_v10  ;;  %v990_v32 = vld [vmem:[#allocation6 + $0xb0] sm:$0xff]   ;;  %v994_v37 = vld [vmem:[#allocation6 + $0xb8] sm:$0xff]   ;;  %v998_v48 = vld [vmem:[#allocation6 + $0x100] sm:$0xff]  }
  0x32   :  { %896 = vmatpush3.bf16.msra.mxu1 %v974_v11  ;;  %875 = vmatprep.subr.bf16.mxu0 %v975_v12  ;;  %v55_v38 = vld [vmem:[#allocation3] sm:$0xff]  ;;  %v1000_v50 = vld [vmem:[#allocation6 + $0x148] sm:$0xff]   ;;  %v999_v52 = vld [vmem:[#allocation6 + $0x180] sm:$0xff]  }
  0x33   :  { %897 = vmatprep.subr.bf16.mxu1 %v976_v13  ;;  %v66_v39 = vrot.slane %v55_v38, %v1158_v35  ;;  %v59_v40 = vcombine.high %v55_v38, %v55_v38  ;;  %v1001_v53 = vld [vmem:[#allocation6 + $0x1c8] sm:$0xff]   ;;  %v1004_v55 = vld [vmem:[#allocation6 + $0x150] sm:$0xff]   ;;  %v1008_v59 = vld [vmem:[#allocation6 + $0x158] sm:$0xff]  }
  0x34   :  { %v1002_v54 = vld [vmem:[#allocation6 + $0x108] sm:$0xff]   ;;  %v1005_v57 = vld [vmem:[#allocation6 + $0x1d0] sm:$0xff]   ;;  %v1009_v61 = vld [vmem:[#allocation6 + $0x1d8] sm:$0xff]  }
  0x35   :  { %876 = vmatpush3.bf16.msra.mxu0 %v977_v14  ;;  %v74_v43 = vcombine.high %v66_v39, %v66_v39  ;;  %v73_v44 = vrot.slane %v59_v40, %v1158_v35  ;;  %v101_v45 = vpack.c.bf16 %v66_v39, %v66_v39  ;;  %v1003_v56 = vld [vmem:[#allocation6 + $0x188] sm:$0xff]   ;;  %v1006_v58 = vld [vmem:[#allocation6 + $0x110] sm:$0xff]   ;;  %v1010_v62 = vld [vmem:[#allocation6 + $0x118] sm:$0xff]  }
  0x36   :  { %898 = vmatpush3.bf16.msra.mxu1 %v978_v15  ;;  %877 = vmatprep.subr.bf16.mxu0 %v979_v16  ;;  %v1007_v60 = vld [vmem:[#allocation6 + $0x190] sm:$0xff]   ;;  %v1012_v63 = vld [vmem:[#allocation6 + $0x160] sm:$0xff]   ;;  %v1011_v0 = vld [vmem:[#allocation6 + $0x198] sm:$0xff]  }
  0x37   :  { %899 = vmatprep.subr.bf16.mxu1 %v980_v17  ;;  %v102_v46 = vpack.c.bf16 %v74_v43, %v74_v43  ;;  %v75_v47 = vcombine.high %v73_v44, %v73_v44  ;;  %v103_v49 = vpack.c.bf16 %v73_v44, %v73_v44  ;;  %v1013_v1 = vld [vmem:[#allocation6 + $0x1e0] sm:$0xff]   ;;  %v1016_v3 = vld [vmem:[#allocation6 + $0x168] sm:$0xff]   ;;  %v1020_v7 = vld [vmem:[#allocation6 + $0x170] sm:$0xff]  }
  0x38   :  { %v1014_v2 = vld [vmem:[#allocation6 + $0x120] sm:$0xff]   ;;  %v1017_v5 = vld [vmem:[#allocation6 + $0x1e8] sm:$0xff]   ;;  %v1021_v9 = vld [vmem:[#allocation6 + $0x1f0] sm:$0xff]  }
  0x39   :  { %878 = vmatpush3.bf16.msra.mxu0 %v981_v18  ;;  %653 = vmatprep.mubr.bf16.mxu0 %v102_v46  ;;  %v104_v51 = vpack.c.bf16 %v75_v47, %v75_v47  ;;  %v1015_v4 = vld [vmem:[#allocation6 + $0x1a0] sm:$0xff]   ;;  %v1018_v6 = vld [vmem:[#allocation6 + $0x128] sm:$0xff]   ;;  %v1022_v10 = vld [vmem:[#allocation6 + $0x130] sm:$0xff]  }
  0x3a   :  { %900 = vmatpush3.bf16.msra.mxu1 %v982_v19  ;;  %879 = vmatprep.subr.bf16.mxu0 %v983_v20  ;;  %v1019_v8 = vld [vmem:[#allocation6 + $0x1a8] sm:$0xff]   ;;  %v1024_v11 = vld [vmem:[#allocation6 + $0x178] sm:$0xff]   ;;  %v1023_v12 = vld [vmem:[#allocation6 + $0x1b0] sm:$0xff]  }
  0x3b   :  { %901 = vmatprep.subr.bf16.mxu1 %v984_v21  ;;  %693 = vmatprep.mubr.bf16.mxu1 %v104_v51  ;;  %v1025_v13 = vld [vmem:[#allocation6 + $0x1f8] sm:$0xff]  }
  0x3c   :  { %v56_v14 = vld [vmem:[#allocation3 + $0x8] sm:$0xff] }
  0x3d   :  { %880 = vmatpush3.bf16.msra.mxu0 %v985_v25  ;;  %v1026_v15 = vld [vmem:[#allocation6 + $0x138] sm:$0xff]   ;;  %v83_v16 = vrot.slane %v56_v14, %v1158_v35  ;;  %v76_v17 = vcombine.high %v56_v14, %v56_v14 }
  0x3e   :  { %902 = vmatpush3.bf16.msra.mxu1 %v986_v26  ;;  %881 = vmatprep.subr.bf16.mxu0 %v987_v27  ;;  %v1027_v18 = vld [vmem:[#allocation6 + $0x1b8] sm:$0xff]   ;;  %v804_v26 = vld [vmem:[%s1181_s2] ss:$0 sm:$0xff]  ;;  %s1106_s2 = smov [#allocation8]  }
  0x3f   :  { %903 = vmatprep.subr.bf16.mxu1 %v988_v28  ;;  %v91_v19 = vcombine.high %v83_v16, %v83_v16  ;;  %v90_v20 = vrot.slane %v76_v17, %v1158_v35  ;;  %v105_v21 = vpack.c.bf16 %v83_v16, %v83_v16  ;;  %53 = vst [vmem:[#allocation2] sm:$0x3] %v804_v26  ;;  %s794_s11 = sshll.u32 %s1106_s2, 4  ;;  %s795_s11 = int_to_ptr.vmem [resolvable:$true] %s794_s11 }
  0x40   :  { %s1073_s12 = scalar_lea.vmem %s795_s11, 32  ;;  %p1078_p3 = scmp.lt.s32.totalorder %s795_s11, %s795_s11 }
  0x41   :  { %882 = vmatpush3.bf16.msra.mxu0 %v989_v31  ;;  %v106_v22 = vpack.c.bf16 %v91_v19, %v91_v19  ;;  %v92_v23 = vcombine.high %v90_v20, %v90_v20  ;;  %v107_v24 = vpack.c.bf16 %v90_v20, %v90_v20  ;;  %p1074_p2 = scmp.ne.s32.totalorder %s795_s11, %s1073_s12  ;;  %p1079_p4 = scmp.lt.s32.totalorder %s1073_s12, %s1073_s12 }
  0x42   :  { %904 = vmatpush3.bf16.msra.mxu1 %v990_v32  ;;  %883 = vmatprep.subr.bf16.mxu0 %v991_v33 }
  0x43   :  { %905 = vmatprep.subr.bf16.mxu1 %v992_v34  ;;  %v108_v25 = vpack.c.bf16 %v92_v23, %v92_v23  ;;  %p1080_p5 = por %p1079_p4, %p1078_p3 }
  0x45   :  { %884 = vmatpush3.bf16.msra.mxu0 %v993_v36  ;;  %p1081_p6 = pnand %p1080_p5, %p1074_p2 }
  0x46   :  { %906 = vmatpush3.bf16.msra.mxu1 %v994_v37  ;;  %913 = vmatprep.subr.bf16.mxu0 %v996_v41 }
  0x47   :  { %935 = vmatprep.subr.bf16.mxu1 %v997_v42 }
  0x48   :  { %654 = vmatmul.mubr.bf16.vlgmr.msra.gmra.mrb[0].mxu0 %v101_v45 }
  0x49   :  { %914 = vmatpush3.bf16.msra.mxu0 %v998_v48  ;;  %694 = vmatmul.mubr.bf16.vlgmr.msra.gmra.mrb[0].mxu1 %v103_v49  ;;  %v54_v48 = vld [vmem:[#allocation2] sm:$0x3] }
  0x4a   :  { %915 = vmatprep.subr.bf16.mxu0 %v1000_v50  ;;  %936 = vmatpush3.bf16.msra.mxu1 %v999_v52 }
  0x4b   :  { %937 = vmatprep.subr.bf16.mxu1 %v1001_v53  ;;  %733 = vmatprep.mubr.bf16.mxu0 %v106_v22 }
  0x4c   :  { %773 = vmatprep.mubr.bf16.mxu1 %v108_v25 }
  0x4d   :  { %916 = vmatpush3.bf16.msra.mxu0 %v1002_v54 }
  0x4e   :  { %917 = vmatprep.subr.bf16.mxu0 %v1004_v55  ;;  %938 = vmatpush3.bf16.msra.mxu1 %v1003_v56 }
  0x4f   :  { %939 = vmatprep.subr.bf16.mxu1 %v1005_v57 }
  0x51   :  { %918 = vmatpush3.bf16.msra.mxu0 %v1006_v58 }
  0x52   :  { %919 = vmatprep.subr.bf16.mxu0 %v1008_v59  ;;  %940 = vmatpush3.bf16.msra.mxu1 %v1007_v60 }
  0x53   :  { %941 = vmatprep.subr.bf16.mxu1 %v1009_v61 }
  0x55   :  { %920 = vmatpush3.bf16.msra.mxu0 %v1010_v62 }
  0x56   :  { %921 = vmatprep.subr.bf16.mxu0 %v1012_v63  ;;  %942 = vmatpush3.bf16.msra.mxu1 %v1011_v0 }
  0x57   :  { %943 = vmatprep.subr.bf16.mxu1 %v1013_v1 }
  0x59   :  { %922 = vmatpush3.bf16.msra.mxu0 %v1014_v2 }
  0x5a   :  { %923 = vmatprep.subr.bf16.mxu0 %v1016_v3  ;;  %944 = vmatpush3.bf16.msra.mxu1 %v1015_v4 }
  0x5b   :  { %945 = vmatprep.subr.bf16.mxu1 %v1017_v5 }
  0x5d   :  { %924 = vmatpush3.bf16.msra.mxu0 %v1018_v6 }
  0x5e   :  { %925 = vmatprep.subr.bf16.mxu0 %v1020_v7  ;;  %946 = vmatpush3.bf16.msra.mxu1 %v1019_v8 }
  0x5f   :  { %947 = vmatprep.subr.bf16.mxu1 %v1021_v9 }
  0x61   :  { %926 = vmatpush3.bf16.msra.mxu0 %v1022_v10 }
  0x62   :  { %927 = vmatprep.subr.bf16.mxu0 %v1024_v11  ;;  %948 = vmatpush3.bf16.msra.mxu1 %v1023_v12 }
  0x63   :  { %949 = vmatprep.subr.bf16.mxu1 %v1025_v13 }
  0x65   :  { %928 = vmatpush3.bf16.msra.mxu0 %v1026_v15 }
  0x66   :  { %950 = vmatpush3.bf16.msra.mxu1 %v1027_v18 }
  0x68   :  { %734 = vmatmul.mubr.bf16.vlgmr.msra.gmra.mrb[4].mxu0 %v105_v21 }
  0x69   :  { %774 = vmatmul.mubr.bf16.vlgmr.msra.gmra.mrb[4].mxu1 %v107_v24 }
 0x11b   :  { %v885_v27 = vpop.f32.mrb[0].mxu0 }
 0x11c   :  { %v886_v28 = vpop.f32.mrb[1].mxu0  ;;  %v907_v29 = vpop.f32.mrb[0].mxu1 }
 0x11d   :  { %v887_v30 = vadd.f32 %v886_v28, %v885_v27  ;;  %v888_v31 = vpop.f32.mrb[2].mxu0  ;;  %v908_v32 = vpop.f32.mrb[1].mxu1 }
 0x11e   :  { %v889_v33 = vpop.f32.mrb[3].mxu0  ;;  %v909_v34 = vadd.f32 %v908_v32, %v907_v29  ;;  %v910_v35 = vpop.f32.mrb[2].mxu1 }
 0x11f   :  { %v911_v36 = vpop.f32.mrb[3].mxu1 }
 0x120   :  { %v696_v37 = vadd.f32 %v909_v34, %v887_v30 }
 0x13b   :  { %v929_v38 = vpop.f32.mrb[4].mxu0 }
 0x13c   :  { %v930_v39 = vpop.f32.mrb[5].mxu0  ;;  %v951_v40 = vpop.f32.mrb[4].mxu1 }
 0x13d   :  { %v931_v41 = vadd.f32 %v930_v39, %v929_v38  ;;  %v932_v42 = vpop.f32.mrb[6].mxu0  ;;  %v952_v43 = vpop.f32.mrb[5].mxu1 }
 0x13e   :  { %v933_v44 = vpop.f32.mrb[7].mxu0  ;;  %v953_v46 = vadd.f32 %v952_v43, %v951_v40  ;;  %v954_v47 = vpop.f32.mrb[6].mxu1 }
 0x13f   :  { %v736_v45 = vadd.f32 %v931_v41, %v696_v37  ;;  %v955_v49 = vpop.f32.mrb[7].mxu1 }
 0x141   :  { %v776_v50 = vadd.f32 %v953_v46, %v736_v45 }
 0x143   :  { %v781_v51 = vadd.f32 %v776_v50, %v54_v48 }
 0x145   :  { %782 = vst [vmem:[#allocation2] sm:$0x3] %v781_v51 }
 0x14c   :  { %v786_v52 = vld [vmem:[#allocation2] sm:$0x3] }
 0x14d   :  { %787 = vst [vmem:[#allocation8] sm:$0x3] %v786_v52 }
 0x14e   :  { %1084 = shalt.err (!%p1081_p6)
}
 0x14f   :  { %s1085_s15 = scalar_lea.hbm %s1182_s3, 32 }
 0x150   :  { %p1086_p7 = scmp.ne.s32.totalorder %s1182_s3, %s1085_s15  ;;  %p1089_p8 = scmp.lt.u32.totalorder %s1085_s15, %s1182_s3 }
 0x152   :  { %p1091_p9 = pnand %p1089_p8, %p1086_p7 }
 0x154   :  { %1094 = shalt.err (!%p1091_p9)
}
 0x155   :  { %797 = dma.vmem_to_hbm [thread:$0]  %s795_s11, 32, %s1182_s3, [#allocation5]  }
 0x156   :  { %1099 = dma.done.wait [#allocation5], 32  }
 0x157   :  { %1100 = vsyncadd [#allocation5], 4294967264 }
 0x158   :  { %801 = vsyncpa [#allocation4], 1 }
 0x159   :  { %802 = vsyncpa [#allocation7], 1 }
 0x15a   :  { %803 = vsyncpa [#allocation5], 1 }

</bundles_post_ra>
